<compile_context>
chip_gen: v7x
topology: tpu7x:2x2x1
jax: 0.10.0
libtpu: 0.0.40
codegen_flags: <defaults>
</compile_context>

<pallas_src>
import functools

import jax
import jax.numpy as jnp
from jax.experimental import pallas as pl
from jax.experimental.pallas import tpu as pltpu

_NCORES = 2            # leading "parallel" grid axis (megacore on v7x; harmless elsewhere)
_LANES = 512           # lane-dense last dim (multiple of 128)
_MAX_TILE_ROWS = 1024  # 1024x512 f32 tile = 2 MiB -> 8 MiB double-buffered across 2 inputs


def _round_up(x, m):
    return ((x + m - 1) // m) * m


def _custom_loss_kernel(pred_ref, target_ref, out_ref, *, w_up):
    i = pl.program_id(1)

    @pl.when(i == 0)
    def _init():
        out_ref[...] = jnp.zeros_like(out_ref)

    p = pred_ref[...]
    t = target_ref[...]
    d = p - t
    ad = jnp.abs(d)
    dd = d * d
    # 0.7*MSE + 0.3*SmoothL1 (beta = 1) with constants folded:
    #   |d| <  1 : 0.7*d^2 + 0.3*(0.5*d^2)   = 0.85*d^2
    #   |d| >= 1 : 0.7*d^2 + 0.3*(|d| - 0.5) = 0.7*d^2 + 0.3*|d| - 0.15
    combined = jnp.where(ad < 1.0, 0.85 * dd, 0.7 * dd + 0.3 * ad - 0.15)
    # Underprediction (pred < target  <=>  d < 0) gets weight w_up, else 1.0.
    contrib = jnp.where(d < 0.0, w_up * combined, combined)  # (tile_rows, LANES)

    tr, ln = contrib.shape
    # Sublane-group partial reduction: reshape is a pure sublane split, the sum over axis 0 is
    # plain elementwise vreg adds on the VPU, accumulated into the resident output block.
    out_ref[...] += contrib.reshape(tr // 8, 8, ln).sum(axis=0)


def custom_loss(pred, target, underprediction_weight=1.05):
    # Mimic PyTorch's dim/shape handling in the wrapper.
    pred = jnp.asarray(pred, jnp.float32)
    target = jnp.asarray(target, jnp.float32)
    if pred.ndim == 0:
        pred = pred[None]
    if target.ndim == 0:
        target = target[None]
    if pred.shape != target.shape:
        pred = pred.reshape(target.shape)

    n = pred.size
    pred_flat = pred.reshape(-1)
    target_flat = target.reshape(-1)

    # Sublane/lane-dense padded layout: (rows_padded, LANES), rows_padded = NCORES*num_tiles*tile_rows.
    rows = max(1, -(-n // _LANES))
    rows_per_core = -(-rows // _NCORES)
    tile_rows = min(_MAX_TILE_ROWS, _round_up(rows_per_core, 8))
    num_tiles = -(-rows_per_core // tile_rows)
    rows_padded = _NCORES * num_tiles * tile_rows
    padded = rows_padded * _LANES

    # Zero padding contributes 0 to the weighted sum (d = 0 -> combined = 0).
    pad_amt = padded - n
    if pad_amt:
        pred_flat = jnp.pad(pred_flat, (0, pad_amt))
        target_flat = jnp.pad(target_flat, (0, pad_amt))
    pred2d = pred_flat.reshape(rows_padded, _LANES)
    target2d = target_flat.reshape(rows_padded, _LANES)

    kernel = functools.partial(_custom_loss_kernel, w_up=float(underprediction_weight))

    partials = pl.pallas_call(
        kernel,
        out_shape=jax.ShapeDtypeStruct((_NCORES * 8, _LANES), jnp.float32),
        grid_spec=pltpu.PrefetchScalarGridSpec(
            num_scalar_prefetch=0,
            grid=(_NCORES, num_tiles),
            in_specs=[
                pl.BlockSpec((tile_rows, _LANES), lambda c, i: (c * num_tiles + i, 0)),
                pl.BlockSpec((tile_rows, _LANES), lambda c, i: (c * num_tiles + i, 0)),
            ],
            out_specs=pl.BlockSpec((8, _LANES), lambda c, i: (c, 0)),
        ),
        compiler_params=pltpu.CompilerParams(
            dimension_semantics=("parallel", "arbitrary")),
        cost_estimate=pl.CostEstimate(
            flops=10 * padded,
            transcendentals=0,
            bytes_accessed=8 * padded + 4 * _NCORES * 8 * _LANES),
    )(pred2d, target2d)

    # Tiny final cross-lane reduce + mean over the TRUE element count (not padded).
    return jnp.sum(partials) / jnp.float32(n)


def _ref_loss(pred, target, w_up=1.05):
    d = pred - target
    mse = d * d
    ad = jnp.abs(d)
    huber = jnp.where(ad < 1.0, 0.5 * d * d, ad - 0.5)
    combined = 0.7 * mse + 0.3 * huber
    w = jnp.where(pred < target, w_up, 1.0)
    return jnp.mean(w * combined)


if __name__ == "__main__":
    key = jax.random.PRNGKey(0)
    k1, k2 = jax.random.split(key)
    # Small shapes consistent with a regression loss over a batch of predictions.
    pred = jax.random.normal(k1, (8, 128), dtype=jnp.float32) * 2.0
    target = jax.random.normal(k2, (8, 128), dtype=jnp.float32) * 2.0

    loss = custom_loss(pred, target)
    jax.block_until_ready(loss)

    ref = _ref_loss(pred, target)
    assert jnp.allclose(loss, ref, rtol=1e-5, atol=1e-5), (loss, ref)

    # Also exercise an odd (padded) size and mismatched pred shape, matching the module's
    # shape-coercion behaviour.
    p2 = jax.random.normal(k1, (310,), dtype=jnp.float32)
    t2 = jax.random.normal(k2, (310, 1), dtype=jnp.float32)[:, 0]
    loss2 = custom_loss(p2.reshape(31, 10), t2)
    jax.block_until_ready(loss2)
    ref2 = _ref_loss(p2, t2)
    assert jnp.allclose(loss2, ref2, rtol=1e-5, atol=1e-5), (loss2, ref2)

    print("KERNEL_OK")
</pallas_src>

<mosaic_0001>
module attributes {stable_mosaic.version = 11 : i64} {
  func.func @_custom_loss_kernel(%arg0: i32, %arg1: i32, %arg2: memref<8x512xf32, #tpu.memory_space<vmem>>, %arg3: memref<8x512xf32, #tpu.memory_space<vmem>>, %arg4: memref<8x512xf32, #tpu.memory_space<vmem>>) attributes {dimension_semantics = [#tpu.dimension_semantics<parallel>, #tpu.dimension_semantics<arbitrary>], iteration_bounds = array<i64: 2, 1>, scalar_prefetch = 0 : i64, scratch_operands = 0 : i64, tpu.core_type = #tpu.core_type<tc>, window_params = [{transform_indices = @transform_0, window_bounds = array<i64: 8, 512>}, {transform_indices = @transform_1, window_bounds = array<i64: 8, 512>}, {transform_indices = @transform_2, window_bounds = array<i64: 8, 512>}]} {
    %c0_i32 = arith.constant 0 : i32
    %0 = arith.cmpi eq, %arg1, %c0_i32 : i32
    %1 = arith.extui %0 : i1 to i32
    %c0_i32_0 = arith.constant 0 : i32
    %2 = arith.cmpi ne, %1, %c0_i32_0 : i32
    scf.if %2 {
      %cst_15 = arith.constant 0.000000e+00 : f32
      %30 = vector.broadcast %cst_15 : f32 to vector<8x512xf32>
      %c0_16 = arith.constant 0 : index
      %c0_17 = arith.constant 0 : index
      %31 = vector.load %arg4[%c0_16, %c0_17] : memref<8x512xf32, #tpu.memory_space<vmem>>, vector<8x512xf32>
      tpu.vector_store %arg4[%c0_16, %c0_17], %30 {strides = array<i32>} : memref<8x512xf32, #tpu.memory_space<vmem>>, vector<8x512xf32>,
    } else {
    }
    %c0 = arith.constant 0 : index
    %c0_1 = arith.constant 0 : index
    %3 = vector.load %arg2[%c0, %c0_1] : memref<8x512xf32, #tpu.memory_space<vmem>>, vector<8x512xf32>
    %c0_2 = arith.constant 0 : index
    %c0_3 = arith.constant 0 : index
    %4 = vector.load %arg3[%c0_2, %c0_3] : memref<8x512xf32, #tpu.memory_space<vmem>>, vector<8x512xf32>
    %5 = arith.subf %3, %4 : vector<8x512xf32>
    %6 = math.absf %5 : vector<8x512xf32>
    %7 = arith.mulf %5, %5 : vector<8x512xf32>
    %cst = arith.constant 1.000000e+00 : f32
    %8 = vector.broadcast %cst : f32 to vector<8x512xf32>
    %9 = arith.cmpf olt, %6, %8 : vector<8x512xf32>
    %cst_4 = arith.constant 8.500000e-01 : f32
    %10 = vector.broadcast %cst_4 : f32 to vector<8x512xf32>
    %11 = arith.mulf %10, %7 : vector<8x512xf32>
    %cst_5 = arith.constant 0.699999988 : f32
    %12 = vector.broadcast %cst_5 : f32 to vector<8x512xf32>
    %13 = arith.mulf %12, %7 : vector<8x512xf32>
    %cst_6 = arith.constant 3.000000e-01 : f32
    %14 = vector.broadcast %cst_6 : f32 to vector<8x512xf32>
    %15 = arith.mulf %14, %6 : vector<8x512xf32>
    %16 = arith.addf %13, %15 : vector<8x512xf32>
    %cst_7 = arith.constant 1.500000e-01 : f32
    %17 = vector.broadcast %cst_7 : f32 to vector<8x512xf32>
    %18 = arith.subf %16, %17 : vector<8x512xf32>
    %19 = arith.select %9, %11, %18 : vector<8x512xi1>, vector<8x512xf32>
    %cst_8 = arith.constant 0.000000e+00 : f32
    %20 = vector.broadcast %cst_8 : f32 to vector<8x512xf32>
    %21 = arith.cmpf olt, %5, %20 : vector<8x512xf32>
    %cst_9 = arith.constant 1.050000e+00 : f32
    %22 = vector.broadcast %cst_9 : f32 to vector<8x512xf32>
    %23 = arith.mulf %22, %19 : vector<8x512xf32>
    %24 = arith.select %21, %23, %19 : vector<8x512xi1>, vector<8x512xf32>
    %c0_10 = arith.constant 0 : index
    %c0_11 = arith.constant 0 : index
    %25 = vector.load %arg4[%c0_10, %c0_11] : memref<8x512xf32, #tpu.memory_space<vmem>>, vector<8x512xf32>
    %26 = vector.shape_cast %24 : vector<8x512xf32> to vector<1x8x512xf32>
    %cst_12 = arith.constant dense<0.000000e+00> : vector<8x512xf32>
    %27 = vector.multi_reduction <add>, %26, %cst_12 [0] : vector<1x8x512xf32> to vector<8x512xf32>
    %28 = arith.addf %25, %27 : vector<8x512xf32>
    %c0_13 = arith.constant 0 : index
    %c0_14 = arith.constant 0 : index
    %29 = vector.load %arg4[%c0_13, %c0_14] : memref<8x512xf32, #tpu.memory_space<vmem>>, vector<8x512xf32>
    tpu.vector_store %arg4[%c0_13, %c0_14], %28 {strides = array<i32>} : memref<8x512xf32, #tpu.memory_space<vmem>>, vector<8x512xf32>,
    return
  }
  func.func @transform_0(%arg0: i32, %arg1: i32) -> (i32, i32) {
    %c1_i32 = arith.constant 1 : i32
    %0 = arith.muli %arg0, %c1_i32 : i32
    %1 = arith.addi %0, %arg1 : i32
    %c0_i32 = arith.constant 0 : i32
    %c0_i32_0 = arith.constant 0 : i32
    return %1, %c0_i32 : i32, i32
  }
  func.func @transform_1(%arg0: i32, %arg1: i32) -> (i32, i32) {
    %c1_i32 = arith.constant 1 : i32
    %0 = arith.muli %arg0, %c1_i32 : i32
    %1 = arith.addi %0, %arg1 : i32
    %c0_i32 = arith.constant 0 : i32
    %c0_i32_0 = arith.constant 0 : i32
    return %1, %c0_i32 : i32, i32
  }
  func.func @transform_2(%arg0: i32, %arg1: i32) -> (i32, i32) {
    %c0_i32 = arith.constant 0 : i32
    %c0_i32_0 = arith.constant 0 : i32
    return %arg0, %c0_i32 : i32, i32
  }
}

</mosaic_0001>

<bundles_post_ra>
// kernel: tpu_custom_call.1
= control target key start
LH: loop header
LB: loop body
LE: loop exit
PB: predicated region body
PF: predicated region fallthrough
CT: control target
= control target key end

     0   :  { %7 = vsyncpa [#allocation3], 0  ;;  %s911_s0 = inlined_call_operand.hbm [shape: f32[16,512], index: 0, kind: input, shape index: {}]   ;;  %s912_s1 = inlined_call_operand.hbm [shape: f32[16,512], index: 1, kind: input, shape index: {}]   ;;  %s913_s2 = inlined_call_operand.hbm [shape: f32[16,512], index: 2, kind: output, shape index: {}]  }
   0x1   :  { %9 = vsyncpa [#allocation3 + $0x1], 0 }
   0x2   :  { %10 = vsyncpa [#allocation6], 0 }
   0x3   :  { %12 = vsyncpa [#allocation6 + $0x1], 0 }
   0x4   :  { %13 = vsyncpa [#allocation4], 0 }
   0x5   :  { %15 = vsyncpa [#allocation4 + $0x1], 0  ;;  %s680_s9 = smov 0   ;;  %s682_s10 = smov 0  }
   0x6   :  { %s684_s11 = smov 0   ;;  %s686_s12 = smov 0  }
   0x7   :  { %s688_s13 = smov 0   ;;  %s690_s14 = smov 0  }
   0x8 LB: > { %s420_s15 = sadd.s32 4294967295, %s660_s14   ;;  %s421_s16 = sadd.s32 4294967294, %s660_s14   ;;  %s660_s14 = sphi %s690_s14, %s21_s14   ;;  %s656_s13 = sphi %s688_s13, %s935_s13   ;;  %s652_s12 = sphi %s686_s12, %s934_s12   ;;  %s648_s11 = sphi %s684_s11, %s933_s11   ;;  %s644_s10 = sphi %s682_s10, %s932_s10   ;;  %s640_s9 = sphi %s680_s9, %s931_s9  }
   0x9   : > { %s33_s17 = sadd.s32 1, %s656_s13  ;;  %s42_s18 = sadd.s32 1, %s648_s11 }
   0xa   : > { %p35_p0 = scmp.ge.s32.totalorder %s33_s17, 2  ;;  %p49_p1 = scmp.ne.s32.totalorder %s648_s11, %s644_s10 }
   0xb   : > { %p50_p2 = scmp.eq.s32.totalorder %s660_s14, 0  ;;  %p55_p3 = scmp.ne.s32.totalorder %s644_s10, %s640_s9 }
   0xc   : > { %s937_s17 = smov (%p35_p0, %s33_s17), 0  ;;  %p56_p5 = scmp.eq.s32.totalorder %s420_s15, 0 }
   0xd   : > { %p721_p4 = por %p50_p2, %p49_p1  ;;  %s39_s20 = ssub.s32 %s656_s13, %s937_s17 }
   0xe   : > { %p107_p6 = scmp.eq.s32.totalorder %s420_s15, 1  ;;  %p40_p7 = scmp.eq.s32.totalorder %s39_s20, 0 }
   0xf   : > { %p727_p8 = por %p56_p5, %p55_p3  ;;  %p113_p10 = scmp.eq.s32.totalorder %s421_s16, 1 }
  0x10   : > { %p731_p9 = por %p107_p6, %p49_p1  ;;  %p463_p13 = scmp.lt.s32.totalorder %s660_s14, 2 }
  0x11   : > { %s917_s21 = scalar_select %p727_p8, 1, 0 }
  0x12   : > { %s918_s22 = scalar_select %p731_p9, 1, 0 }
  0x13   : > { %s736_s23 = scalar_select %p40_p7, %s648_s11, %s42_s18  }
  0x14   : > { %p738_p11 = por %p113_p10, %p55_p3  ;;  %s745_s25 = sand.u32 1, %s648_s11  }
  0x15   : > { %s424_s26 = sshll.u32 %s745_s25, 5  ;;  %s443_s27 = sshll.u32 %s656_s13, 9 }
  0x16   : > { %s919_s24 = scalar_select %p738_p11, 1, 0 }
  0x17   : > { %s754_s30 = scalar_lea.hbm %s911_s0, %s443_s27  ;;  %s137_s3 = scalar_lea.vmem [#allocation2], %s424_s26 }
  0x18   : > { %s146_s4 = sshll.u32 %s137_s3, 4  ;;  %p762_p0 = pnand %p463_p13, %p721_p4  ;;  %s758_s4 = int_to_ptr.vmem [resolvable:$true] %s146_s4 }
  0x19   : > { %s134_s6 = scalar_lea.sflag [#allocation3], %s745_s25  ;;  %s514_s7 = scalar_lea.hbm %s754_s30, 512 }
  0x1a   : > { %p515_p3 = scmp.ne.s32.totalorder %s754_s30, %s514_s7  ;;  %p516_p5 = pneg %p762_p0 }
  0x1b   : > { %s519_s16 = scalar_lea.hbm %s911_s0, 1024  ;;  %p520_p4 = scmp.lt.u32.totalorder %s754_s30, %s911_s0 }
  0x1c   : > { %p517_p6 = pnand %p516_p5, %p515_p3  ;;  %p521_p10 = scmp.lt.u32.totalorder %s519_s16, %s514_s7 }
  0x1d   : > { %p523_p12 = scmp.lt.u32.totalorder %s514_s7, %s754_s30 }
  0x1e   : > { %p518_p7 = pneg %p517_p6  ;;  %p522_p13 = por %p521_p10, %p520_p4 }
  0x20   : > { %p524_p1 = por %p523_p12, %p522_p13 }
  0x22   : > { %p525_p2 = pnand %p524_p1, %p518_p7 }
  0x24   : > { %528 = shalt.err (!%p525_p2)
}
  0x25   : > { %s529_s20 = scalar_lea.vmem %s758_s4, 512  ;;  %s662_s28 = smov [#allocation2]  }
  0x26   : > { %p530_p3 = scmp.ne.s32.totalorder %s758_s4, %s529_s20  ;;  %s534_s29 = sshll.u32 %s662_s28, 4  ;;  %s535_s29 = int_to_ptr.vmem [resolvable:$false] %s534_s29 }
  0x27   : > { %s536_s3 = scalar_lea.vmem %s535_s29, 1024  ;;  %p537_p9 = scmp.lt.s32.totalorder %s758_s4, %s535_s29 }
  0x28   : > { %p532_p6 = pnand %p530_p3, %p516_p5  ;;  %p538_p4 = scmp.lt.s32.totalorder %s536_s3, %s529_s20 }
  0x2a   : > { %p533_p11 = pneg %p532_p6  ;;  %p539_p10 = por %p538_p4, %p537_p9 }
  0x2c   : > { %p540_p12 = pnand %p539_p10, %p533_p11 }
  0x2e   : > { %543 = shalt.err (!%p540_p12)
}
  0x2f   : > { %455 = dma.hbm_to_vmem [thread:$0]  (!%p762_p0), %s754_s30, 512, %s758_s4, %s134_s6  }
  0x30   : > { %p921_p1 = scmp.lt.s32.totalorder %s660_s14, 3  ;;  %p922_p2 = scmp.ge.s32.totalorder %s660_s14, 1 }
  0x31   : > { %s807_s16 = scalar_lea.hbm %s912_s1, %s443_s27  ;;  %s157_s18 = scalar_lea.vmem [#allocation5], %s424_s26 }
  0x32   : > { %p798_p7 = pnand %p922_p2, %p921_p1  ;;  %s166_s19 = sshll.u32 %s157_s18, 4  ;;  %s167_s19 = int_to_ptr.vmem [resolvable:$true] %s166_s19 }
  0x33   : > { %s154_s30 = scalar_lea.sflag [#allocation6], %s745_s25  ;;  %s544_s4 = scalar_lea.hbm %s807_s16, 512 }
  0x34   : > { %s923_s7 = scalar_select %p798_p7, 1, 0 }
  0x35   : > { %p545_p9 = scmp.ne.s32.totalorder %s807_s16, %s544_s4  ;;  %s549_s27 = scalar_lea.hbm %s912_s1, 1024 }
  0x36   : > { %p550_p3 = scmp.lt.u32.totalorder %s807_s16, %s912_s1  ;;  %p551_p6 = scmp.lt.u32.totalorder %s549_s27, %s544_s4 }
  0x37   : > { %p547_p11 = pnand %p545_p9, %p516_p5  ;;  %p553_p10 = scmp.lt.u32.totalorder %s544_s4, %s807_s16 }
  0x38   : > { %p552_p4 = por %p551_p6, %p550_p3 }
  0x39   : > { %p548_p13 = pneg %p547_p11 }
  0x3a   : > { %p554_p12 = por %p553_p10, %p552_p4 }
  0x3c   : > { %p555_p1 = pnand %p554_p12, %p548_p13 }
  0x3e   : > { %558 = shalt.err (!%p555_p1)
}
  0x3f   : > { %s559_s25 = scalar_lea.vmem %s167_s19, 512  ;;  %s663_s26 = smov [#allocation5]  }
  0x40   : > { %p560_p2 = scmp.ne.s32.totalorder %s167_s19, %s559_s25  ;;  %s564_s3 = sshll.u32 %s663_s26, 4  ;;  %s565_s3 = int_to_ptr.vmem [resolvable:$false] %s564_s3 }
  0x41   : > { %s566_s8 = scalar_lea.vmem %s565_s3, 1024  ;;  %p567_p8 = scmp.lt.s32.totalorder %s167_s19, %s565_s3 }
  0x42   : > { %p562_p9 = pnand %p560_p2, %p516_p5  ;;  %p568_p7 = scmp.lt.s32.totalorder %s566_s8, %s559_s25 }
  0x44   : > { %p563_p11 = pneg %p562_p9  ;;  %p569_p3 = por %p568_p7, %p567_p8 }
  0x46   : > { %p570_p6 = pnand %p569_p3, %p563_p11 }
  0x48   : > { %573 = shalt.err (!%p570_p6)
}
  0x49   : > { %458 = dma.hbm_to_vmem [thread:$0]  (!%p762_p0), %s807_s16, 512, %s167_s19, %s154_s30  }
  0x4a   : > { %p924_p13 = scmp.ne.s32.totalorder %s923_s7, 0 }
  0x4b   : > { %s834_s15 = sand.u32 (!%p924_p13), 1, %s644_s10   ;;  %p925_p8 = scmp.ne.s32.totalorder (!%p924_p13), %s917_s21, 0 }
  0x4c   : > { %175 = sbr.rel (%p924_p13) target bundleno = 121 (0x79), region = 28  ;;  %s837_s18 = sshll.u32 (!%p924_p13), %s834_s15, 5 }
  0x4d   : > { %s178_s4 = scalar_lea.sflag (!%p924_p13), [#allocation3], %s834_s15  ;;  %s181_s6 = scalar_lea.vmem (!%p924_p13), [#allocation2], %s837_s18 }
  0x53   : > { %627 = dma.done.wait (%p925_p8), %s178_s4, 512  }
  0x54   : > { %629 = vsyncadd (%p925_p8), %s178_s4, 4294966784  ;;  %s187_s5 = scalar_lea.sflag [#allocation6], %s834_s15  ;;  %s190_s7 = scalar_lea.vmem [#allocation5], %s837_s18 }
  0x55   : > { %631 = dma.done.wait (%p925_p8), %s187_s5, 512  }
  0x56   : > { %633 = vsyncadd (%p925_p8), %s187_s5, 4294966784  ;;  %v226_v0 = vld [vmem:[%s181_s6] sm:$0xff]  ;;  %v227_v2 = vld [vmem:[%s181_s6 + $0x8] sm:$0xff]  ;;  %s215_s21 = scalar_lea.vmem [#allocation7], %s837_s18  ;;  %s445_s16 = sshll.u32 %s652_s12, 9 }
  0x57   : > { %v230_v1 = vld [vmem:[%s190_s7] sm:$0xff]  ;;  %v231_v4 = vld [vmem:[%s190_s7 + $0x8] sm:$0xff]  ;;  %v228_v5 = vld [vmem:[%s181_s6 + $0x10] sm:$0xff]  ;;  %s317_s19 = sshll.u32 %s215_s21, 4  ;;  %s862_s27 = scalar_lea.hbm %s913_s2, %s445_s16  ;;  %s864_s19 = int_to_ptr.vmem [resolvable:$true] %s317_s19 }
  0x58   : > { %v234_v3 = vsub.f32 %v226_v0, %v230_v1  ;;  %v232_v6 = vld [vmem:[%s190_s7 + $0x10] sm:$0xff]  ;;  %v235_v7 = vsub.f32 %v227_v2, %v231_v4  ;;  %v229_v9 = vld [vmem:[%s181_s6 + $0x18] sm:$0xff]  ;;  %s303_s28 = scalar_lea.sflag [#allocation4], %s834_s15  ;;  %s574_s29 = scalar_lea.vmem %s864_s19, 512 }
  0x59   : > { %v236_v8 = vsub.f32 %v228_v5, %v232_v6  ;;  %v233_v10 = vld [vmem:[%s190_s7 + $0x18] sm:$0xff]  ;;  %p575_p0 = scmp.ne.s32.totalorder %s864_s19, %s574_s29  ;;  %p928_p5 = scmp.ne.s32.totalorder %s918_s22, 0 }
  0x5a   : > { %v238_v11 = vand.u32 2147483647, %v234_v3  ;;  %v242_v12 = vmul.f32 %v234_v3, %v234_v3  ;;  %v237_v13 = vsub.f32 %v229_v9, %v233_v10  ;;  %v239_v14 = vand.u32 2147483647, %v235_v7  ;;  %s664_s12 = smov [#allocation7]  }
  0x5b   : > { %v243_v15 = vmul.f32 %v235_v7, %v235_v7  ;;  %v240_v16 = vand.u32 2147483647, %v236_v8  ;;  %v244_v18 = vmul.f32 %v236_v8, %v236_v8  ;;  %vm274_vm3 = vcmp.lt.f32.partialorder %v234_v3, 0.0  ;;  %p576_p7 = pnand %p575_p0, %p928_p5  ;;  %s578_s25 = sshll.u32 %s664_s12, 4  ;;  %s579_s25 = int_to_ptr.vmem [resolvable:$false] %s578_s25 }
  0x5c   : > { %v254_v17 = vmul.f32 0.7, %v242_v12  ;;  %v258_v19 = vmul.f32 0.3, %v238_v11  ;;  %vm851_vm0 = vcmp.lt.f32.partialorder %v238_v11, 1.0  ;;  %v245_v23 = vmul.f32 %v237_v13, %v237_v13  ;;  %s580_s26 = scalar_lea.vmem %s579_s25, 1024  ;;  %p581_p10 = scmp.lt.s32.totalorder %s864_s19, %s579_s25 }
  0x5d   : > { %v255_v21 = vmul.f32 0.7, %v243_v15  ;;  %v259_v22 = vmul.f32 0.3, %v239_v14  ;;  %v250_v24 = vmul.f32 0.85, %v242_v12  ;;  %p577_p4 = pneg %p576_p7  ;;  %p582_p12 = scmp.lt.s32.totalorder %s580_s26, %s574_s29 }
  0x5e   : > { %v262_v25 = vadd.f32 %v258_v19, %v254_v17  ;;  %v256_v26 = vmul.f32 0.7, %v244_v18  ;;  %v260_v27 = vmul.f32 0.3, %v240_v16  ;;  %v251_v28 = vmul.f32 0.85, %v243_v15 }
  0x5f   : > { %v263_v29 = vadd.f32 %v259_v22, %v255_v21  ;;  %v241_v30 = vand.u32 2147483647, %v237_v13  ;;  %v257_v31 = vmul.f32 0.7, %v245_v23  ;;  %vm247_vm1 = vcmp.lt.f32.partialorder %v239_v14, 1.0  ;;  %p583_p1 = por %p582_p12, %p581_p10 }
  0x60   : > { %v434_v32 = vadd.f32 -0.15, %v262_v25  ;;  %v252_v33 = vmul.f32 0.85, %v244_v18  ;;  %v264_v34 = vadd.f32 %v260_v27, %v256_v26  ;;  %vm248_vm2 = vcmp.lt.f32.partialorder %v240_v16, 1.0 }
  0x61   : > { %v435_v35 = vadd.f32 -0.15, %v263_v29  ;;  %v261_v36 = vmul.f32 0.3, %v241_v30  ;;  %vm275_vm4 = vcmp.lt.f32.partialorder %v235_v7, 0.0  ;;  %vm276_vm5 = vcmp.lt.f32.partialorder %v236_v8, 0.0  ;;  %p584_p2 = pnand %p583_p1, %p577_p4 }
  0x62   : > { %v270_v37 = vsel %vm851_vm0, %v250_v24, %v434_v32  ;;  %v436_v38 = vadd.f32 -0.15, %v264_v34  ;;  %v253_v41 = vmul.f32 0.85, %v245_v23  ;;  %vm249_vm6 = vcmp.lt.f32.partialorder %v241_v30, 1.0 }
  0x63   : > { %v278_v39 = vmul.f32 1.05, %v270_v37  ;;  %v271_v40 = vsel %vm247_vm1, %v251_v28, %v435_v35  ;;  %v265_v42 = vadd.f32 %v261_v36, %v257_v31  ;;  %vm277_vm7 = vcmp.lt.f32.partialorder %v237_v13, 0.0 }
  0x64   : > { %v279_v43 = vmul.f32 1.05, %v271_v40  ;;  %v272_v44 = vsel %vm248_vm2, %v252_v33, %v436_v38 }
  0x65   : > { %v282_v45 = vsel %vm274_vm3, %v278_v39, %v270_v37  ;;  %v280_v46 = vmul.f32 1.05, %v272_v44  ;;  %v437_v47 = vadd.f32 -0.15, %v265_v42 }
  0x66   : > { %v283_v48 = vsel %vm275_vm4, %v279_v43, %v271_v40  ;;  %298 = vst [vmem:[%s215_s21] sm:$0xff] %v282_v45 }
  0x67   : > { %v284_v49 = vsel %vm276_vm5, %v280_v46, %v272_v44  ;;  %v273_v50 = vsel %vm249_vm6, %v253_v41, %v437_v47  ;;  %299 = vst [vmem:[%s215_s21 + $0x8] sm:$0xff] %v283_v48 }
  0x68   : > { %v281_v51 = vmul.f32 1.05, %v273_v50  ;;  %300 = vst [vmem:[%s215_s21 + $0x10] sm:$0xff] %v284_v49 }
  0x6a   : > { %v285_v52 = vsel %vm277_vm7, %v281_v51, %v273_v50 }
  0x6b   : > { %301 = vst [vmem:[%s215_s21 + $0x18] sm:$0xff] %v285_v52 }
  0x6c   : > { %587 = shalt.err (!%p584_p2)
}
  0x6d   : > { %s588_s3 = scalar_lea.hbm %s862_s27, 512  ;;  %s592_s18 = scalar_lea.hbm %s913_s2, 1024 }
  0x6e   : > { %p589_p9 = scmp.ne.s32.totalorder %s862_s27, %s588_s3  ;;  %p593_p6 = scmp.lt.u32.totalorder %s862_s27, %s913_s2 }
  0x6f   : > { %p594_p13 = scmp.lt.u32.totalorder %s592_s18, %s588_s3  ;;  %p596_p0 = scmp.lt.u32.totalorder %s588_s3, %s862_s27 }
  0x70   : > { %p590_p11 = pnand %p589_p9, %p928_p5 }
  0x71   : > { %p595_p8 = por %p594_p13, %p593_p6 }
  0x72   : > { %p591_p3 = pneg %p590_p11 }
  0x73   : > { %p597_p7 = por %p596_p0, %p595_p8 }
  0x75   : > { %p598_p4 = pnand %p597_p7, %p591_p3 }
  0x77   : > { %601 = shalt.err (!%p598_p4)
}
  0x78   : > { %450 = dma.vmem_to_hbm [thread:$0]  (%p928_p5), %s864_s19, 512, %s862_s27, %s303_s28  }
  0x79 PF: > { %s329_s5 = sand.u32 1, %s640_s9   ;;  %p929_p10 = scmp.ne.s32.totalorder %s919_s24, 0 }
  0x7a   : > { %p930_p12 = scmp.ge.s32.totalorder %s660_s14, 2  ;;  %s330_s7 = scalar_lea.sflag [#allocation4], %s329_s5 }
  0x7c   : > { %p460_p1 = pnand %p930_p12, %p929_p10 }
  0x7e   : > { %635 = dma.done.wait (!%p460_p1), %s330_s7, 512  }
  0x7f   : > { %637 = vsyncadd (!%p460_p1), %s330_s7, 4294966784  ;;  %s21_s14 = sadd.s32 1, %s660_s14   ;;  %s931_s9 = smov %s644_s10 }
  0x80   : > { %p18_p2 = scmp.ge.s32.totalorder %s21_s14, 4   ;;  %s932_s10 = smov %s648_s11 }
  0x81   : > { %s933_s11 = smov %s736_s23  ;;  %s934_s12 = smov %s656_s13 }
  0x82   : > { %s935_s13 = smov %s937_s17  ;;  %20 = sbr.rel (!%p18_p2) target bundleno = 8 (0x8), region = 90 }
  0x89   :  { %335 = vsyncpa [#allocation3], 1 }
  0x8a   :  { %337 = vsyncpa [#allocation3 + $0x1], 1 }
  0x8b   :  { %338 = vsyncpa [#allocation6], 1 }
  0x8c   :  { %340 = vsyncpa [#allocation6 + $0x1], 1 }
  0x8d   :  { %341 = vsyncpa [#allocation4], 1 }
  0x8e   :  { %343 = vsyncpa [#allocation4 + $0x1], 1 }

</bundles_post_ra>
